<compile_context>
chip_gen: v6e
topology: v6e:2x2x1
jax: 0.10.0
libtpu: 0.0.40
codegen_flags: <defaults>
</compile_context>

<pallas_src>
import math

import jax
import jax.numpy as jnp
from jax import lax
from jax.experimental import pallas as pl
from jax.experimental.pallas import tpu as pltpu

_INV_SQRT2 = 1.0 / math.sqrt(2.0)


def _gelu_exact(x):
    """Exact GELU: x * 0.5 * (1 + erf(x / sqrt(2))), computed in f32."""
    xf = x.astype(jnp.float32)
    return (xf * 0.5 * (1.0 + lax.erf(xf * _INV_SQRT2))).astype(x.dtype)


def _gelu_kernel(x_ref, o_ref):
    xf = x_ref[...].astype(jnp.float32)
    y = xf * 0.5 * (1.0 + lax.erf(xf * _INV_SQRT2))
    o_ref[...] = y.astype(o_ref.dtype)


def _choose_lane_width(n_main: int) -> int:
    """Lane width: any multiple of 128 gives unmasked (lane-dense) stores.

    Prefer a wider row only when it still leaves >= 64 rows, so the grid can
    be split into >= 8 blocks of >= 8 rows each.  n_main is a multiple of 128,
    so 128 always divides.
    """
    for w in (1024, 512, 256, 128):
        if n_main % w == 0 and n_main // w >= 64:
            return w
    return 128


def _choose_block_rows(rows: int, row_bytes: int) -> int:
    """Rows per block: multiple of 8 (or == rows for a single full block)."""
    # 4 pipelined buffers (2x input + 2x output double-buffers) within ~16 MiB.
    vmem_budget = 16 * 1024 * 1024
    tm_cap = max(8, (vmem_budget // (4 * row_bytes)) // 8 * 8)

    # Keep each block past the ~0.35 us/step overhead knee (~0.5 MiB).
    knee_bytes = 512 * 1024
    tm_knee = ((knee_bytes + row_bytes - 1) // row_bytes + 7) // 8 * 8
    tm_knee = max(8, min(tm_knee, tm_cap))

    # Aim for >= 8 grid steps (>= 4 per TensorCore on a 2-TC chip).
    tm_target = ((rows + 7) // 8 + 7) // 8 * 8

    tm = min(max(tm_target, tm_knee), tm_cap)
    if tm >= rows:
        return rows  # single full-extent block (legal even if rows % 8 != 0)
    return tm


def _gelu_pallas_2d(x2: jax.Array) -> jax.Array:
    rows, w = x2.shape
    itemsize = jnp.dtype(x2.dtype).itemsize
    tm = _choose_block_rows(rows, w * itemsize)
    grid = (pl.cdiv(rows, tm),)

    return pl.pallas_call(
        _gelu_kernel,
        out_shape=jax.ShapeDtypeStruct((rows, w), x2.dtype),
        grid_spec=pltpu.PrefetchScalarGridSpec(
            num_scalar_prefetch=0,
            grid=grid,
            in_specs=[pl.BlockSpec((tm, w), lambda i: (i, 0))],
            out_specs=pl.BlockSpec((tm, w), lambda i: (i, 0)),
        ),
        compiler_params=pltpu.CompilerParams(
            dimension_semantics=("parallel",),
            vmem_limit_bytes=32 * 1024 * 1024,
        ),
    )(x2)


def gelu_pallas(x: jax.Array) -> jax.Array:
    orig_shape = x.shape
    n = x.size
    if n == 0:
        return x

    flat = x.reshape(-1)
    n_main = (n // 128) * 128
    n_tail = n - n_main

    if n_main == 0:
        # Fewer than 128 elements total: not worth a kernel launch.
        return _gelu_exact(flat).reshape(orig_shape)

    w = _choose_lane_width(n_main)
    rows = n_main // w
    main_out = _gelu_pallas_2d(flat[:n_main].reshape(rows, w)).reshape(-1)

    if n_tail == 0:
        return main_out.reshape(orig_shape)

    # Misaligned size: handle the <=127-element tail outside the kernel
    # (no jnp.pad / trailing slice over the whole tensor).
    tail_out = _gelu_exact(flat[n_main:])
    return jnp.concatenate([main_out, tail_out]).reshape(orig_shape)


if __name__ == "__main__":
    key = jax.random.PRNGKey(0)
    # Shape consistent with a typical NCHW activation tensor.
    x = jax.random.normal(key, (2, 4, 16, 16), dtype=jnp.float32)

    y = gelu_pallas(x)
    jax.block_until_ready(y)

    # Reference: exact erf-based GELU (same as torch.nn.functional.gelu default).
    ref = x * 0.5 * (1.0 + lax.erf(x * _INV_SQRT2))
    assert y.shape == x.shape and y.dtype == x.dtype
    assert jnp.allclose(y, ref, atol=1e-5, rtol=1e-5)

    # Sanity-check the misaligned-size path (128-aligned prefix + jnp tail).
    x2 = jax.random.normal(jax.random.PRNGKey(1), (3, 7, 11), dtype=jnp.float32)
    y2 = gelu_pallas(x2)
    jax.block_until_ready(y2)
    ref2 = x2 * 0.5 * (1.0 + lax.erf(x2 * _INV_SQRT2))
    assert y2.shape == x2.shape and y2.dtype == x2.dtype
    assert jnp.allclose(y2, ref2, atol=1e-5, rtol=1e-5)

    print("KERNEL_OK")
</pallas_src>

<mosaic_0001>
module attributes {stable_mosaic.version = 11 : i64} {
  func.func @_gelu_kernel(%arg0: i32, %arg1: memref<16x128xf32, #tpu.memory_space<vmem>>, %arg2: memref<16x128xf32, #tpu.memory_space<vmem>>) attributes {dimension_semantics = [#tpu.dimension_semantics<parallel>], iteration_bounds = array<i64: 1>, scalar_prefetch = 0 : i64, scratch_operands = 0 : i64, tpu.core_type = #tpu.core_type<tc>, window_params = [{transform_indices = @transform_0, window_bounds = array<i64: 16, 128>}, {transform_indices = @transform_1, window_bounds = array<i64: 16, 128>}]} {
    %c0 = arith.constant 0 : index
    %c0_0 = arith.constant 0 : index
    %0 = vector.load %arg1[%c0, %c0_0] : memref<16x128xf32, #tpu.memory_space<vmem>>, vector<16x128xf32>
    %cst = arith.constant 5.000000e-01 : f32
    %1 = vector.broadcast %cst : f32 to vector<16x128xf32>
    %2 = arith.mulf %0, %1 : vector<16x128xf32>
    %cst_1 = arith.constant 0.707106769 : f32
    %3 = vector.broadcast %cst_1 : f32 to vector<16x128xf32>
    %4 = arith.mulf %0, %3 : vector<16x128xf32>
    %5 = math.erf %4 : vector<16x128xf32>
    %cst_2 = arith.constant 1.000000e+00 : f32
    %6 = vector.broadcast %cst_2 : f32 to vector<16x128xf32>
    %7 = arith.addf %6, %5 : vector<16x128xf32>
    %8 = arith.mulf %2, %7 : vector<16x128xf32>
    %c0_3 = arith.constant 0 : index
    %c0_4 = arith.constant 0 : index
    %9 = vector.load %arg2[%c0_3, %c0_4] : memref<16x128xf32, #tpu.memory_space<vmem>>, vector<16x128xf32>
    tpu.vector_store %arg2[%c0_3, %c0_4], %8 {strides = array<i32>} : memref<16x128xf32, #tpu.memory_space<vmem>>, vector<16x128xf32>,
    return
  }
  func.func @transform_0(%arg0: i32) -> (i32, i32) {
    %c0_i32 = arith.constant 0 : i32
    %c0_i32_0 = arith.constant 0 : i32
    return %arg0, %c0_i32 : i32, i32
  }
  func.func @transform_1(%arg0: i32) -> (i32, i32) {
    %c0_i32 = arith.constant 0 : i32
    %c0_i32_0 = arith.constant 0 : i32
    return %arg0, %c0_i32 : i32, i32
  }
}

</mosaic_0001>

<bundles_post_ra>
// kernel: tpu_custom_call.1
= control target key start
LH: loop header
LB: loop body
LE: loop exit
PB: predicated region body
PF: predicated region fallthrough
CT: control target
= control target key end

     0   :  { %6 = vsyncpa [#allocation3], 0  ;;  %s132_s0 = inlined_call_operand.hbm [shape: f32[16,128], index: 0, kind: input, shape index: {}]   ;;  %s133_s1 = inlined_call_operand.hbm [shape: f32[16,128], index: 1, kind: output, shape index: {}]  }
   0x1   :  { %7 = vsyncpa [#allocation4], 0  ;;  %s106_s6 = smov [#allocation2]  }
   0x2   :  { %s13_s7 = sshll.u32 %s106_s6, 4  ;;  %s14_s7 = int_to_ptr.vmem [resolvable:$true] %s13_s7 }
   0x3   :  { %s70_s8 = scalar_lea.vmem %s14_s7, 256  ;;  %p75_p1 = scmp.lt.s32.totalorder %s14_s7, %s14_s7 }
   0x4   :  { %p71_p0 = scmp.ne.s32.totalorder %s14_s7, %s70_s8  ;;  %p76_p2 = scmp.lt.s32.totalorder %s70_s8, %s70_s8 }
   0x6   :  { %p77_p3 = por %p76_p2, %p75_p1 }
   0x8   :  { %p78_p4 = pnand %p77_p3, %p71_p0 }
   0xa   :  { %81 = shalt.err (!%p78_p4)
}
   0xb   :  { %s107_s9 = smov 128   ;;  %s108_s10 = smov 8  }
   0xc   :  { %19 = dma.hbm_to_vmem [thread:$0]  %s132_s0, 256, %s14_s7, [#allocation3], %s107_s9, %s107_s9, %s108_s10  }
   0xd   :  { %102 = dma.done.wait [#allocation3], 256  }
   0xe   :  { %103 = vsyncadd [#allocation3], 4294967040  ;;  %v23_v0 = vld [vmem:[#allocation2] sm:$0xff]  ;;  %v24_v1 = vld [vmem:[#allocation2 + $0x8] sm:$0xff]  ;;  %s109_s13 = smov [#allocation5]  }
   0xf   :  { %v27_v2 = vmul.f32 0.70710677, %v23_v0  ;;  %v28_v3 = vmul.f32 0.70710677, %v24_v1  ;;  %v25_v4 = vmul.f32 0.5, %v23_v0  ;;  %v26_v6 = vmul.f32 0.5, %v24_v1 }
  0x10   :  { %s42_s14 = sshll.u32 %s109_s13, 4  ;;  %s43_s14 = int_to_ptr.vmem [resolvable:$true] %s42_s14 }
  0x11   :  { %58 = verf.f32 %v27_v2  ;;  %s82_s0 = scalar_lea.vmem %s43_s14, 256  ;;  %p87_p6 = scmp.lt.s32.totalorder %s43_s14, %s43_s14 }
  0x12   :  { %60 = verf.f32 %v28_v3  ;;  %p83_p5 = scmp.ne.s32.totalorder %s43_s14, %s82_s0  ;;  %p88_p7 = scmp.lt.s32.totalorder %s82_s0, %s82_s0 }
  0x14   :  { %p89_p8 = por %p88_p7, %p87_p6 }
  0x16   :  { %p90_p9 = pnand %p89_p8, %p83_p5 }
  0x1e   :  { %v59_v5 = vpop.eup %58 }
  0x1f   :  { %v61_v7 = vpop.eup %60  ;;  %v31_v8 = vadd.f32 1.0, %v59_v5 }
  0x20   :  { %v32_v9 = vadd.f32 1.0, %v61_v7 }
  0x21   :  { %v33_v10 = vmul.f32 %v31_v8, %v25_v4 }
  0x22   :  { %v34_v11 = vmul.f32 %v32_v9, %v26_v6 }
  0x23   :  { %35 = vst [vmem:[#allocation5] sm:$0xff] %v33_v10 }
  0x24   :  { %36 = vst [vmem:[#allocation5 + $0x8] sm:$0xff] %v34_v11 }
  0x25   :  { %93 = shalt.err (!%p90_p9)
}
  0x26   :  { %48 = dma.vmem_to_hbm [thread:$0]  %s43_s14, 256, %s133_s1, [#allocation4], %s107_s9, %s107_s9, %s108_s10  }
  0x27   :  { %104 = dma.done.wait [#allocation4], 256  }
  0x28   :  { %105 = vsyncadd [#allocation4], 4294967040 }
  0x29   :  { %52 = vsyncpa [#allocation3], 1 }
  0x2a   :  { %53 = vsyncpa [#allocation4], 1 }

</bundles_post_ra>
